<compile_context>
chip_gen: v6e
topology: v6e:2x2x1
jax: 0.10.0
libtpu: 0.0.40
codegen_flags: <defaults>
</compile_context>

<pallas_src>
import functools

import jax
import jax.numpy as jnp
from jax import lax
from jax.experimental import pallas as pl
from jax.experimental.pallas import tpu as pltpu


def _round_up(x, m):
    return ((x + m - 1) // m) * m


def _conv_down_kernel(x_ref, w1_ref, b1_ref, w2_ref, b2_ref, sel_ref,
                      conv_ref, pool_ref, *, H, W, nb):
    """One grid step = `nb` whole images, batch fused onto the lane axis.

    x_ref    : (1, Cinp, nb*H*W)     f32   nb images concatenated on the flat axis
    w1_ref   : (Coutp, 9*Cinp)       bf16  3x3 taps folded into the contraction dim
    b1_ref   : (Coutp, 1)            f32
    w2_ref   : (Coutp, 9*Coutp)      bf16
    b2_ref   : (Coutp, 1)            f32
    sel_ref  : (nb*H*W, nb*Hp*Wp)    f32   0/1 crop + stride-2 selection matrix
    conv_ref : (1, Coutp, nb*H*W)    f32   UNcropped conv2 slab (wrapper crops)
    pool_ref : (1, Coutp, nb*Hp*Wp)  f32
    """
    Coutp = w1_ref.shape[0]
    L = nb * H * W
    PAD = _round_up(2 * W + 2, 128)          # lane-multiple pad >= largest tap offset
    taps = [dy * W + dx for dy in range(3) for dx in range(3)]

    def conv3x3(act, w, b):
        # act: (C, L) f32 row-stride-W activation; w: (Coutp, 9*C) bf16; b: (Coutp, 1)
        C = act.shape[0]
        ap = jnp.concatenate([act, jnp.zeros((C, PAD), act.dtype)], axis=1)
        # 9 tap slices stacked on the (aligned) sublane axis -> one wide MXU matmul.
        rhs = jnp.concatenate([ap[:, o:o + L] for o in taps], axis=0)       # (9*C, L)
        y = jnp.dot(w, rhs.astype(jnp.bfloat16),
                    preferred_element_type=jnp.float32)                      # (Coutp, L)
        return jnp.maximum(y + b, 0.0)                                       # f32

    h1 = conv3x3(x_ref[0], w1_ref[...], b1_ref[...])
    h2 = conv3x3(h1, w2_ref[...], b2_ref[...])

    # Lane-dense store of the uncropped conv slab; the crop to (H-4, W-4) is one
    # cheap XLA slice in the wrapper (fused with the NCHW transpose).
    conv_ref[0] = h2

    # 2x2 / stride-2 max pool on the flat layout: lane-shifted maxima (VPU + lane
    # shifts), then crop + stride-2 down-select as ONE 0/1 selection matmul on the
    # otherwise idle MXU (exact in f32: each column selects exactly one element).
    h2p = jnp.concatenate([h2, jnp.zeros((Coutp, PAD), h2.dtype)], axis=1)
    win = jnp.maximum(jnp.maximum(h2p[:, 0:L],     h2p[:, 1:L + 1]),
                      jnp.maximum(h2p[:, W:L + W], h2p[:, W + 1:L + W + 1]))
    pool_ref[0] = jnp.dot(win, sel_ref[...], preferred_element_type=jnp.float32)


def _pick_batch_block(N, max_nb):
    """Largest divisor of N giving >=2 grid steps; prefer an even grid (v7x 2 TCs)."""
    cands = [d for d in range(min(N, max_nb), 0, -1) if N % d == 0]
    for d in cands:
        if N // d >= 2 and (N // d) % 2 == 0:
            return d
    for d in cands:
        if N // d >= 2:
            return d
    return cands[0]


def conv_down(x_nchw, w1_hwio, b1, w2_hwio, b2, *, max_batch_block=8):
    """Forward of Conv_down.  Returns (pool_x, conv_x) in NCHW, like PyTorch."""
    N, Cin, H, W = x_nchw.shape
    Cout = w1_hwio.shape[-1]
    assert H >= 5 and W >= 5, "two VALID 3x3 convs need H, W >= 5"
    H2, W2 = H - 4, W - 4
    Hp, Wp = H2 // 2, W2 // 2                 # MaxPool2d(2, 2), floor semantics

    Cinp = _round_up(Cin, 8)                  # sublane-aligned im2col chunks
    Coutp = _round_up(Cout, 8)
    HW = H * W

    # TODO(synk): for UNet-scale H, W add an H-row-tiled grid axis with a 2-row halo
    # (and per-row-block pooling selection) so the 9x im2col blow-up and the
    # selection matrix stay within v7x's 64 MiB VMEM; at these demo sizes the
    # whole-image block is a few tens of KiB.
    nb = _pick_batch_block(N, max_batch_block)
    G = N // nb
    L = nb * HW

    # ---- inputs: channel-major, batch fused on the flat spatial (lane) axis ----
    x_g = x_nchw.astype(jnp.float32).reshape(G, nb, Cin, HW)
    x_g = jnp.transpose(x_g, (0, 2, 1, 3)).reshape(G, Cin, L)
    if Cinp > Cin:
        x_g = jnp.concatenate([x_g, jnp.zeros((G, Cinp - Cin, L), jnp.float32)], axis=1)

    def fold_weight(w_hwio, cin, cinp, cout, coutp):
        # (3,3,cin,cout) -> (coutp, 9*cinp); row index = (ky*3+kx)*cinp + ci,
        # matching the kernel's im2col chunk stacking.  Padded rows/cols are zero.
        w = w_hwio.astype(jnp.float32)
        if cinp > cin:
            w = jnp.concatenate([w, jnp.zeros((3, 3, cinp - cin, cout), jnp.float32)], axis=2)
        if coutp > cout:
            w = jnp.concatenate([w, jnp.zeros((3, 3, cinp, coutp - cout), jnp.float32)], axis=3)
        return jnp.transpose(w.reshape(9 * cinp, coutp)).astype(jnp.bfloat16)

    def pad_bias(b, cout, coutp):
        bc = b.reshape(cout, 1).astype(jnp.float32)
        if coutp > cout:
            bc = jnp.concatenate([bc, jnp.zeros((coutp - cout, 1), jnp.float32)], axis=0)
        return bc

    wm1 = fold_weight(w1_hwio, Cin, Cinp, Cout, Coutp)
    wm2 = fold_weight(w2_hwio, Cout, Coutp, Cout, Coutp)
    b1c = pad_bias(b1, Cout, Coutp)
    b2c = pad_bias(b2, Cout, Coutp)

    # 0/1 selection matrix: column (n, pr, pc) picks flat position n*HW + 2*pr*W + 2*pc
    # (the 2x2-window anchor) -> crop-to-valid + stride-2 in a single matmul.
    n_i = jnp.arange(nb)[:, None, None]
    pr = jnp.arange(Hp)[None, :, None]
    pc = jnp.arange(Wp)[None, None, :]
    src = (n_i * HW + 2 * pr * W + 2 * pc).reshape(nb * Hp * Wp)
    sel = (jnp.arange(L)[:, None] == src[None, :]).astype(jnp.float32)      # (L, nb*Hp*Wp)

    kernel = functools.partial(_conv_down_kernel, H=H, W=W, nb=nb)

    conv_flat, pool_flat = pl.pallas_call(
        kernel,
        out_shape=(
            jax.ShapeDtypeStruct((G, Coutp, L), jnp.float32),
            jax.ShapeDtypeStruct((G, Coutp, nb * Hp * Wp), jnp.float32),
        ),
        grid_spec=pltpu.PrefetchScalarGridSpec(
            num_scalar_prefetch=0,
            grid=(G,),
            in_specs=[
                pl.BlockSpec((1, Cinp, L), lambda g: (g, 0, 0)),
                pl.BlockSpec((Coutp, 9 * Cinp), lambda g: (0, 0)),
                pl.BlockSpec((Coutp, 1), lambda g: (0, 0)),
                pl.BlockSpec((Coutp, 9 * Coutp), lambda g: (0, 0)),
                pl.BlockSpec((Coutp, 1), lambda g: (0, 0)),
                pl.BlockSpec((L, nb * Hp * Wp), lambda g: (0, 0)),
            ],
            out_specs=[
                pl.BlockSpec((1, Coutp, L), lambda g: (g, 0, 0)),
                pl.BlockSpec((1, Coutp, nb * Hp * Wp), lambda g: (g, 0, 0)),
            ],
        ),
        compiler_params=pltpu.CompilerParams(
            dimension_semantics=("parallel",),
        ),
    )(x_g, wm1, b1c, wm2, b2c, sel)

    # Back to NCHW + crop: one fused XLA copy per output (the reshapes are metadata).
    conv = conv_flat.reshape(G, Coutp, nb, H, W)
    conv = jnp.transpose(conv, (0, 2, 1, 3, 4)).reshape(N, Coutp, H, W)
    conv_nchw = conv[:, :Cout, :H2, :W2]

    pool = pool_flat.reshape(G, Coutp, nb, Hp, Wp)
    pool = jnp.transpose(pool, (0, 2, 1, 3, 4)).reshape(N, Coutp, Hp, Wp)
    pool_nchw = pool[:, :Cout]
    return pool_nchw, conv_nchw


def _reference(x_nchw, w1_hwio, b1, w2_hwio, b2):
    """Pure-JAX reference with the same numerics (bf16 conv inputs, f32 accumulation)."""
    def conv_relu(h, w_hwio, b):
        w_oihw = jnp.transpose(w_hwio, (3, 2, 0, 1)).astype(jnp.bfloat16)
        y = lax.conv_general_dilated(
            h.astype(jnp.bfloat16), w_oihw, window_strides=(1, 1), padding="VALID",
            dimension_numbers=("NCHW", "OIHW", "NCHW"),
            preferred_element_type=jnp.float32)
        return jnp.maximum(y + b.reshape(1, -1, 1, 1).astype(jnp.float32), 0.0)

    h = conv_relu(conv_relu(x_nchw.astype(jnp.float32), w1_hwio, b1), w2_hwio, b2)
    pooled = lax.reduce_window(
        h, -jnp.inf, lax.max,
        window_dimensions=(1, 1, 2, 2), window_strides=(1, 1, 2, 2),
        padding="VALID")
    return pooled, h


if __name__ == "__main__":
    key = jax.random.PRNGKey(0)
    k_x, k_w1, k_b1, k_w2, k_b2 = jax.random.split(key, 5)

    N, Cin, Cout, H, W = 2, 4, 8, 16, 16

    x = jax.random.normal(k_x, (N, Cin, H, W), dtype=jnp.float32)
    # Synthetic parameters in HWIO (ky, kx, cin, cout) layout.
    w1 = jax.random.normal(k_w1, (3, 3, Cin, Cout), dtype=jnp.float32) * 0.1
    b1 = jax.random.normal(k_b1, (Cout,), dtype=jnp.float32) * 0.1
    w2 = jax.random.normal(k_w2, (3, 3, Cout, Cout), dtype=jnp.float32) * 0.1
    b2 = jax.random.normal(k_b2, (Cout,), dtype=jnp.float32) * 0.1

    pool_x, conv_x = conv_down(x, w1, b1, w2, b2)
    jax.block_until_ready((pool_x, conv_x))

    ref_pool, ref_conv = _reference(x, w1, b1, w2, b2)
    assert conv_x.shape == (N, Cout, H - 4, W - 4)
    assert pool_x.shape == (N, Cout, (H - 4) // 2, (W - 4) // 2)
    assert jnp.allclose(conv_x, ref_conv, atol=2e-3, rtol=2e-3)
    assert jnp.allclose(pool_x, ref_pool, atol=2e-3, rtol=2e-3)

    print("KERNEL_OK")
</pallas_src>

<mosaic_0001>
module attributes {stable_mosaic.version = 11 : i64} {
  func.func @_conv_down_kernel(%arg0: i32, %arg1: memref<1x8x256xf32, #tpu.memory_space<vmem>>, %arg2: memref<8x72xbf16, #tpu.memory_space<vmem>>, %arg3: memref<8x1xf32, #tpu.memory_space<vmem>>, %arg4: memref<8x72xbf16, #tpu.memory_space<vmem>>, %arg5: memref<8x1xf32, #tpu.memory_space<vmem>>, %arg6: memref<256x36xf32, #tpu.memory_space<vmem>>, %arg7: memref<1x8x256xf32, #tpu.memory_space<vmem>>, %arg8: memref<1x8x36xf32, #tpu.memory_space<vmem>>) attributes {dimension_semantics = [#tpu.dimension_semantics<parallel>], iteration_bounds = array<i64: 2>, scalar_prefetch = 0 : i64, scratch_operands = 0 : i64, tpu.core_type = #tpu.core_type<tc>, window_params = [{transform_indices = @transform_0, window_bounds = array<i64: 1, 8, 256>}, {pipeline_mode = #tpu.pipeline_mode<synchronous>, transform_indices = @transform_1, window_bounds = array<i64: 8, 72>}, {pipeline_mode = #tpu.pipeline_mode<synchronous>, transform_indices = @transform_2, window_bounds = array<i64: 8, 1>}, {pipeline_mode = #tpu.pipeline_mode<synchronous>, transform_indices = @transform_3, window_bounds = array<i64: 8, 72>}, {pipeline_mode = #tpu.pipeline_mode<synchronous>, transform_indices = @transform_4, window_bounds = array<i64: 8, 1>}, {pipeline_mode = #tpu.pipeline_mode<synchronous>, transform_indices = @transform_5, window_bounds = array<i64: 256, 36>}, {transform_indices = @transform_6, window_bounds = array<i64: 1, 8, 256>}, {transform_indices = @transform_7, window_bounds = array<i64: 1, 8, 36>}]} {
    %c0 = arith.constant 0 : index
    %c0_0 = arith.constant 0 : index
    %c0_1 = arith.constant 0 : index
    %0 = vector.load %arg1[%c0, %c0_0, %c0_1] : memref<1x8x256xf32, #tpu.memory_space<vmem>>, vector<1x8x256xf32>
    %1 = vector.shape_cast %0 : vector<1x8x256xf32> to vector<8x256xf32>
    %c0_2 = arith.constant 0 : index
    %c0_3 = arith.constant 0 : index
    %2 = vector.load %arg2[%c0_2, %c0_3] : memref<8x72xbf16, #tpu.memory_space<vmem>>, vector<8x72xbf16>
    %c0_4 = arith.constant 0 : index
    %c0_5 = arith.constant 0 : index
    %3 = vector.load %arg3[%c0_4, %c0_5] : memref<8x1xf32, #tpu.memory_space<vmem>>, vector<8x1xf32>
    %cst = arith.constant 0.000000e+00 : f32
    %4 = vector.broadcast %cst : f32 to vector<8x128xf32>
    %5 = tpu.concatenate %1, %4 in 1 : vector<8x256xf32>, vector<8x128xf32> -> vector<8x384xf32>
    %6 = vector.extract_strided_slice %5 {offsets = [0, 0], sizes = [8, 256], strides = [1, 1]} : vector<8x384xf32> to vector<8x256xf32>
    %7 = vector.extract_strided_slice %5 {offsets = [0, 1], sizes = [8, 256], strides = [1, 1]} : vector<8x384xf32> to vector<8x256xf32>
    %8 = vector.extract_strided_slice %5 {offsets = [0, 2], sizes = [8, 256], strides = [1, 1]} : vector<8x384xf32> to vector<8x256xf32>
    %9 = vector.extract_strided_slice %5 {offsets = [0, 16], sizes = [8, 256], strides = [1, 1]} : vector<8x384xf32> to vector<8x256xf32>
    %10 = vector.extract_strided_slice %5 {offsets = [0, 17], sizes = [8, 256], strides = [1, 1]} : vector<8x384xf32> to vector<8x256xf32>
    %11 = vector.extract_strided_slice %5 {offsets = [0, 18], sizes = [8, 256], strides = [1, 1]} : vector<8x384xf32> to vector<8x256xf32>
    %12 = vector.extract_strided_slice %5 {offsets = [0, 32], sizes = [8, 256], strides = [1, 1]} : vector<8x384xf32> to vector<8x256xf32>
    %13 = vector.extract_strided_slice %5 {offsets = [0, 33], sizes = [8, 256], strides = [1, 1]} : vector<8x384xf32> to vector<8x256xf32>
    %14 = vector.extract_strided_slice %5 {offsets = [0, 34], sizes = [8, 256], strides = [1, 1]} : vector<8x384xf32> to vector<8x256xf32>
    %15 = tpu.concatenate %6, %7, %8, %9, %10, %11, %12, %13, %14 in 0 : vector<8x256xf32>, vector<8x256xf32>, vector<8x256xf32>, vector<8x256xf32>, vector<8x256xf32>, vector<8x256xf32>, vector<8x256xf32>, vector<8x256xf32>, vector<8x256xf32> -> vector<72x256xf32>
    %16 = arith.truncf %15 : vector<72x256xf32> to vector<72x256xbf16>
    %cst_6 = arith.constant dense<0.000000e+00> : vector<8x256xf32>
    %17 = tpu.matmul %2, %16, %cst_6 {dimension_numbers = #tpu.dot_dimension_numbers<[1], [0], [0], [1], [0, 0, 1, 1], [], []>} : vector<8x72xbf16>, vector<72x256xbf16>, vector<8x256xf32> -> vector<8x256xf32>
    %18 = vector.broadcast %3 : vector<8x1xf32> to vector<8x256xf32>
    %19 = arith.addf %17, %18 : vector<8x256xf32>
    %cst_7 = arith.constant 0.000000e+00 : f32
    %20 = vector.broadcast %cst_7 : f32 to vector<8x256xf32>
    %21 = arith.maximumf %19, %20 : vector<8x256xf32>
    %c0_8 = arith.constant 0 : index
    %c0_9 = arith.constant 0 : index
    %22 = vector.load %arg4[%c0_8, %c0_9] : memref<8x72xbf16, #tpu.memory_space<vmem>>, vector<8x72xbf16>
    %c0_10 = arith.constant 0 : index
    %c0_11 = arith.constant 0 : index
    %23 = vector.load %arg5[%c0_10, %c0_11] : memref<8x1xf32, #tpu.memory_space<vmem>>, vector<8x1xf32>
    %cst_12 = arith.constant 0.000000e+00 : f32
    %24 = vector.broadcast %cst_12 : f32 to vector<8x128xf32>
    %25 = tpu.concatenate %21, %24 in 1 : vector<8x256xf32>, vector<8x128xf32> -> vector<8x384xf32>
    %26 = vector.extract_strided_slice %25 {offsets = [0, 0], sizes = [8, 256], strides = [1, 1]} : vector<8x384xf32> to vector<8x256xf32>
    %27 = vector.extract_strided_slice %25 {offsets = [0, 1], sizes = [8, 256], strides = [1, 1]} : vector<8x384xf32> to vector<8x256xf32>
    %28 = vector.extract_strided_slice %25 {offsets = [0, 2], sizes = [8, 256], strides = [1, 1]} : vector<8x384xf32> to vector<8x256xf32>
    %29 = vector.extract_strided_slice %25 {offsets = [0, 16], sizes = [8, 256], strides = [1, 1]} : vector<8x384xf32> to vector<8x256xf32>
    %30 = vector.extract_strided_slice %25 {offsets = [0, 17], sizes = [8, 256], strides = [1, 1]} : vector<8x384xf32> to vector<8x256xf32>
    %31 = vector.extract_strided_slice %25 {offsets = [0, 18], sizes = [8, 256], strides = [1, 1]} : vector<8x384xf32> to vector<8x256xf32>
    %32 = vector.extract_strided_slice %25 {offsets = [0, 32], sizes = [8, 256], strides = [1, 1]} : vector<8x384xf32> to vector<8x256xf32>
    %33 = vector.extract_strided_slice %25 {offsets = [0, 33], sizes = [8, 256], strides = [1, 1]} : vector<8x384xf32> to vector<8x256xf32>
    %34 = vector.extract_strided_slice %25 {offsets = [0, 34], sizes = [8, 256], strides = [1, 1]} : vector<8x384xf32> to vector<8x256xf32>
    %35 = tpu.concatenate %26, %27, %28, %29, %30, %31, %32, %33, %34 in 0 : vector<8x256xf32>, vector<8x256xf32>, vector<8x256xf32>, vector<8x256xf32>, vector<8x256xf32>, vector<8x256xf32>, vector<8x256xf32>, vector<8x256xf32>, vector<8x256xf32> -> vector<72x256xf32>
    %36 = arith.truncf %35 : vector<72x256xf32> to vector<72x256xbf16>
    %cst_13 = arith.constant dense<0.000000e+00> : vector<8x256xf32>
    %37 = tpu.matmul %22, %36, %cst_13 {dimension_numbers = #tpu.dot_dimension_numbers<[1], [0], [0], [1], [0, 0, 1, 1], [], []>} : vector<8x72xbf16>, vector<72x256xbf16>, vector<8x256xf32> -> vector<8x256xf32>
    %38 = vector.broadcast %23 : vector<8x1xf32> to vector<8x256xf32>
    %39 = arith.addf %37, %38 : vector<8x256xf32>
    %cst_14 = arith.constant 0.000000e+00 : f32
    %40 = vector.broadcast %cst_14 : f32 to vector<8x256xf32>
    %41 = arith.maximumf %39, %40 : vector<8x256xf32>
    %c0_15 = arith.constant 0 : index
    %c0_16 = arith.constant 0 : index
    %c0_17 = arith.constant 0 : index
    %42 = vector.load %arg7[%c0_15, %c0_16, %c0_17] : memref<1x8x256xf32, #tpu.memory_space<vmem>>, vector<1x8x256xf32>
    %43 = vector.shape_cast %42 : vector<1x8x256xf32> to vector<8x256xf32>
    %44 = vector.shape_cast %41 : vector<8x256xf32> to vector<1x8x256xf32>
    tpu.vector_store %arg7[%c0_15, %c0_16, %c0_17], %44 {strides = array<i32>} : memref<1x8x256xf32, #tpu.memory_space<vmem>>, vector<1x8x256xf32>,
    %cst_18 = arith.constant 0.000000e+00 : f32
    %45 = vector.broadcast %cst_18 : f32 to vector<8x128xf32>
    %46 = tpu.concatenate %41, %45 in 1 : vector<8x256xf32>, vector<8x128xf32> -> vector<8x384xf32>
    %47 = vector.extract_strided_slice %46 {offsets = [0, 0], sizes = [8, 256], strides = [1, 1]} : vector<8x384xf32> to vector<8x256xf32>
    %48 = vector.extract_strided_slice %46 {offsets = [0, 1], sizes = [8, 256], strides = [1, 1]} : vector<8x384xf32> to vector<8x256xf32>
    %49 = arith.maximumf %47, %48 : vector<8x256xf32>
    %50 = vector.extract_strided_slice %46 {offsets = [0, 16], sizes = [8, 256], strides = [1, 1]} : vector<8x384xf32> to vector<8x256xf32>
    %51 = vector.extract_strided_slice %46 {offsets = [0, 17], sizes = [8, 256], strides = [1, 1]} : vector<8x384xf32> to vector<8x256xf32>
    %52 = arith.maximumf %50, %51 : vector<8x256xf32>
    %53 = arith.maximumf %49, %52 : vector<8x256xf32>
    %c0_19 = arith.constant 0 : index
    %c0_20 = arith.constant 0 : index
    %54 = vector.load %arg6[%c0_19, %c0_20] : memref<256x36xf32, #tpu.memory_space<vmem>>, vector<256x36xf32>
    %cst_21 = arith.constant dense<0.000000e+00> : vector<8x36xf32>
    %55 = tpu.matmul %53, %54, %cst_21 {dimension_numbers = #tpu.dot_dimension_numbers<[1], [0], [0], [1], [0, 0, 1, 1], [], []>} : vector<8x256xf32>, vector<256x36xf32>, vector<8x36xf32> -> vector<8x36xf32>
    %c0_22 = arith.constant 0 : index
    %c0_23 = arith.constant 0 : index
    %c0_24 = arith.constant 0 : index
    %56 = vector.load %arg8[%c0_22, %c0_23, %c0_24] : memref<1x8x36xf32, #tpu.memory_space<vmem>>, vector<1x8x36xf32>
    %57 = vector.shape_cast %56 : vector<1x8x36xf32> to vector<8x36xf32>
    %58 = vector.shape_cast %55 : vector<8x36xf32> to vector<1x8x36xf32>
    tpu.vector_store %arg8[%c0_22, %c0_23, %c0_24], %58 {strides = array<i32>} : memref<1x8x36xf32, #tpu.memory_space<vmem>>, vector<1x8x36xf32>,
    return
  }
  func.func @transform_0(%arg0: i32) -> (i32, i32, i32) {
    %c0_i32 = arith.constant 0 : i32
    %c0_i32_0 = arith.constant 0 : i32
    %c0_i32_1 = arith.constant 0 : i32
    return %arg0, %c0_i32, %c0_i32_0 : i32, i32, i32
  }
  func.func @transform_1(%arg0: i32) -> (i32, i32) {
    %c0_i32 = arith.constant 0 : i32
    %c0_i32_0 = arith.constant 0 : i32
    %c0_i32_1 = arith.constant 0 : i32
    return %c0_i32, %c0_i32_0 : i32, i32
  }
  func.func @transform_2(%arg0: i32) -> (i32, i32) {
    %c0_i32 = arith.constant 0 : i32
    %c0_i32_0 = arith.constant 0 : i32
    %c0_i32_1 = arith.constant 0 : i32
    return %c0_i32, %c0_i32_0 : i32, i32
  }
  func.func @transform_3(%arg0: i32) -> (i32, i32) {
    %c0_i32 = arith.constant 0 : i32
    %c0_i32_0 = arith.constant 0 : i32
    %c0_i32_1 = arith.constant 0 : i32
    return %c0_i32, %c0_i32_0 : i32, i32
  }
  func.func @transform_4(%arg0: i32) -> (i32, i32) {
    %c0_i32 = arith.constant 0 : i32
    %c0_i32_0 = arith.constant 0 : i32
    %c0_i32_1 = arith.constant 0 : i32
    return %c0_i32, %c0_i32_0 : i32, i32
  }
  func.func @transform_5(%arg0: i32) -> (i32, i32) {
    %c0_i32 = arith.constant 0 : i32
    %c0_i32_0 = arith.constant 0 : i32
    %c0_i32_1 = arith.constant 0 : i32
    return %c0_i32, %c0_i32_0 : i32, i32
  }
  func.func @transform_6(%arg0: i32) -> (i32, i32, i32) {
    %c0_i32 = arith.constant 0 : i32
    %c0_i32_0 = arith.constant 0 : i32
    %c0_i32_1 = arith.constant 0 : i32
    return %arg0, %c0_i32, %c0_i32_0 : i32, i32, i32
  }
  func.func @transform_7(%arg0: i32) -> (i32, i32, i32) {
    %c0_i32 = arith.constant 0 : i32
    %c0_i32_0 = arith.constant 0 : i32
    %c0_i32_1 = arith.constant 0 : i32
    return %arg0, %c0_i32, %c0_i32_0 : i32, i32, i32
  }
}

</mosaic_0001>

<bundles_post_ra>
// kernel: tpu_custom_call.1
= control target key start
LH: loop header
LB: loop body
LE: loop exit
PB: predicated region body
PF: predicated region fallthrough
CT: control target
= control target key end

     0   :  { %13 = vsyncpa [#allocation3], 0  ;;  %s1580_s0 = inlined_call_operand.vmem [shape: f32[2,8,256], index: 0, kind: input, shape index: {}]   ;;  %s1581_s1 = inlined_call_operand.vmem [shape: bf16[8,72], index: 1, kind: input, shape index: {}]   ;;  %s1582_s2 = inlined_call_operand.vmem [shape: f32[8,1], index: 2, kind: input, shape index: {}]   ;;  %s1583_s3 = inlined_call_operand.vmem [shape: bf16[8,72], index: 3, kind: input, shape index: {}]   ;;  %s1584_s4 = inlined_call_operand.vmem [shape: f32[8,1], index: 4, kind: input, shape index: {}]   ;;  %s1585_s5 = inlined_call_operand.vmem [shape: f32[256,36], index: 5, kind: input, shape index: {}]   ;;  %s1586_s6 = inlined_call_operand.hbm [shape: f32[2,8,256], index: 6, kind: output, shape index: {0}]   ;;  %s1587_s7 = inlined_call_operand.hbm [shape: f32[2,8,36], index: 7, kind: output, shape index: {1}]  }
   0x1   :  { %15 = vsyncpa [#allocation3 + $0x1], 0 }
   0x2   :  { %16 = vsyncpa [#allocation5], 0 }
   0x3   :  { %18 = vsyncpa [#allocation5 + $0x1], 0  ;;  %s1192_s24 = smov 0   ;;  %s1194_s25 = smov 0  }
   0x4   :  { %s1196_s26 = smov 0   ;;  %s1198_s27 = smov 0  }
   0x5 LB: > { %s1213_s28 = sadd.s32 4294967295, %s1138_s27   ;;  %s847_s29 = sadd.s32 4294967294, %s1138_s27   ;;  %s1138_s27 = sphi %s1198_s27, %s1593_s27   ;;  %s1134_s26 = sphi %s1196_s26, %s1592_s26   ;;  %s1130_s25 = sphi %s1194_s25, %s1591_s25   ;;  %s1126_s24 = sphi %s1192_s24, %s1590_s24  }
   0x6   : > { %s1217_s30 = sadd.s32 1, %s1138_s27   ;;  %s162_s8 = sadd.s32 1, %s1134_s26 }
   0x7   : > { %s159_s9 = ssub.s32 %s1138_s27, %s1217_s30  ;;  %p172_p0 = scmp.ne.s32.totalorder %s1134_s26, %s1130_s25 }
   0x8   : > { %p160_p1 = scmp.eq.s32.totalorder %s159_s9, 0  ;;  %p173_p2 = scmp.eq.s32.totalorder %s1213_s28, 1 }
   0x9   : > { %p178_p3 = scmp.ne.s32.totalorder %s1130_s25, %s1126_s24  ;;  %p179_p4 = scmp.eq.s32.totalorder %s847_s29, 1 }
   0xa   : > { %s1228_s10 = scalar_select %p160_p1, %s1134_s26, %s162_s8  }
   0xb   : > { %p1230_p5 = por %p173_p2, %p172_p0  ;;  %p1234_p6 = por %p179_p4, %p178_p3 }
   0xc   : > { %p850_p7 = scmp.ge.s32.totalorder %s1138_s27, 1  ;;  %p246_p8 = scmp.lt.s32.totalorder %s1138_s27, 3 }
   0xe   : > { %p247_p9 = pnand %p850_p7, %p246_p8 }
   0xf   : > { %p283_p10 = scmp.lt.s32.totalorder (!%p247_p9), %s1213_s28, 1  ;;  %s1141_s13 = smov (!%p247_p9), 94  }
  0x10   : > { %250 = sbr.rel (%p247_p9) target bundleno = 1172 (0x494), region = 44  ;;  %s1142_s19 = smov (!%p247_p9), 96  }
  0x11   : > { %s1143_s20 = smov (!%p247_p9), 95   ;;  %s1144_s21 = smov (!%p247_p9), 111  }
  0x12   : > { %s1145_s22 = smov (!%p247_p9), 110   ;;  %s1146_s23 = smov (!%p247_p9), 126  }
  0x13   : > { %s1148_s29 = smov (!%p247_p9), 112   ;;  %s1149_s8 = smov (!%p247_p9), 127  }
  0x14   : > { %s1150_s16 = smov (!%p247_p9), [#allocation2]  }
  0x15   : > { %v1140_v0 = vmov 0.0   ;;  %s284_s14 = scalar_select %p283_p10, %s1213_s28, 1  ;;  %v1147_v5 = vmov 0   ;;  %v292_v6 = vld [vmem:[%s1582_s2] sm:$0xff]  ;;  %vm379_vm0 = vcmask 769024   ;;  %vm403_vm1 = vcmask 1043456  }
  0x16   : > { %377 = vrot.lane.b32.xlu0 %v1140_v0, %s1141_s13  ;;  %442 = vmatprep.mubr.bf16.mxu1 %v1147_v5  ;;  %vm357_vm2 = vcmask 785408   ;;  %vm368_vm3 = vcmask 777216   ;;  %vm335_vm4 = vcmask 908288   ;;  %vm346_vm5 = vcmask 900096   ;;  %s1052_s17 = sshll.u32 %s1150_s16, 4  ;;  %s1053_s17 = int_to_ptr.vmem [resolvable:$false] %s1052_s17 }
  0x17   : > { %s866_s15 = sshll.u32 %s284_s14, 4  ;;  %997 = vset.pattern.permute.xlu0 %v1147_v5  ;;  %vm313_vm6 = vcmask 1031168   ;;  %vm324_vm7 = vcmask 916480   ;;  %vm302_vm8 = vcmask 1039360   ;;  %vm399_vm9 = vcmask 588800  }
  0x18   : > { %s287_s18 = scalar_lea.vmem %s1580_s0, %s866_s15 }
  0x19   : > { %v1246_v1 = vld [vmem:[%s287_s18 + $0x8] sm:$0xff]  ;;  %v1248_v2 = vld [vmem:[%s287_s18] sm:$0xff]  ;;  %s1054_s18 = scalar_lea.vmem %s1053_s17, 512 }
  0x1a   : > { %v962_v3 = vpack.i.bf16 %v1140_v0, %v1246_v1  ;;  %v957_v4 = vpack.i.bf16 %v1246_v1, %v1248_v2 }
  0x1c   : > { %963 = vrot.lane.b32.xlu1 %v962_v3, %s1142_s19  ;;  %958 = vrot.lane.b32.xlu0 %v957_v4, %s1141_s13  ;;  %v291_v4 = vld [vmem:[%s1581_s1] sm:$0xf] }
  0x20   : > { %968 = vrot.lane.b32.xlu1 %v962_v3, %s1143_s20  ;;  %351 = vrot.lane.b32.xlu0 %v1248_v2, %s1142_s19 }
  0x24   : > { %362 = vrot.lane.b32.xlu1 %v1248_v2, %s1143_s20  ;;  %973 = vrot.lane.b32.xlu0 %v962_v3, %s1144_s21 }
  0x28   : > { %978 = vrot.lane.b32.xlu1 %v962_v3, %s1145_s22  ;;  %329 = vrot.lane.b32.xlu0 %v1248_v2, %s1144_s21 }
  0x2c   : > { %340 = vrot.lane.b32.xlu1 %v1248_v2, %s1145_s22  ;;  %983 = vrot.lane.b32.xlu0 %v962_v3, %s1146_s23 }
  0x30   : > { %988 = vrot.lane.b32.xlu1 %v962_v3, %s1148_s29  ;;  %307 = vrot.lane.b32.xlu0 %v1248_v2, %s1146_s23 }
  0x34   : > { %318 = vrot.lane.b32.xlu1 %v1248_v2, %s1148_s29  ;;  %993 = vrot.lane.b32.xlu0 %v962_v3, %s1149_s8 }
  0x38   : > { %296 = vrot.lane.b32.xlu1 %v1248_v2, %s1149_s8  ;;  %396 = vperm.xlu0 %997, %v292_v6  }
  0x88   : > { %v1280_v7 = vpop.permute.xlu0 %377 }
  0x8e   : > { %v1282_v8 = vpop.permute.xlu1 %963  ;;  %v959_v9 = vpop.permute.xlu0 %958 }
  0x8f   : > { %v961_v10 = vunpack.i.h.bf16 %v959_v9  ;;  %v960_v11 = vunpack.i.l.bf16 %v959_v9  ;;  %v966_v12 = vunpack.i.h.bf16 %v1282_v8  ;;  %v965_v13 = vunpack.i.l.bf16 %v1282_v8 }
  0x91   : > { %v381_v14 = vsel %vm379_vm0, %v961_v10, %v1280_v7  ;;  %v380_v15 = vsel %vm379_vm0, %v960_v11, %v961_v10  ;;  %v359_v23 = vsel %vm357_vm2, %v965_v13, %v966_v12 }
  0x92   : > { %v1289_v16 = vpop.permute.xlu1 %968  ;;  %v352_v17 = vpop.permute.xlu0 %351  ;;  %v393_v18 = vpack.c.bf16 %v381_v14, %v381_v14  ;;  %v392_v19 = vpack.c.bf16 %v380_v15, %v380_v15 }
  0x93   : > { %v971_v20 = vunpack.i.h.bf16 %v1289_v16  ;;  %v970_v21 = vunpack.i.l.bf16 %v1289_v16  ;;  %v358_v28 = vsel %vm357_vm2, %v352_v17, %v965_v13 }
  0x94   : > { %855 = vmatprep.subr.msk.bf16.mxu1 %vm403_vm1, %v393_v18  ;;  %v405_v22 = vsel %vm403_vm1, %v392_v19, 0 }
  0x95   : > { %417 = vmatpush1.bf16.msra.mxu1 %v405_v22  ;;  %v370_v24 = vsel %vm368_vm3, %v970_v21, %v971_v20 }
  0x96   : > { %v363_v25 = vpop.permute.xlu1 %362  ;;  %v1301_v26 = vpop.permute.xlu0 %973  ;;  %v391_v27 = vpack.c.bf16 %v370_v24, %v359_v23 }
  0x97   : > { %v369_v29 = vsel %vm368_vm3, %v363_v25, %v970_v21  ;;  %v976_v31 = vunpack.i.h.bf16 %v1301_v26  ;;  %v975_v32 = vunpack.i.l.bf16 %v1301_v26 }
  0x98   : > { %v390_v30 = vpack.c.bf16 %v369_v29, %v358_v28  ;;  %418 = vmatprep.subr.bf16.mxu1 %v391_v27 }
  0x99   : > { %v337_v37 = vsel %vm335_vm4, %v975_v32, %v976_v31 }
  0x9a   : > { %v1307_v33 = vpop.permute.xlu1 %978  ;;  %v330_v34 = vpop.permute.xlu0 %329  ;;  %419 = vmatpush1.bf16.msra.mxu1 %v390_v30 }
  0x9b   : > { %v981_v35 = vunpack.i.h.bf16 %v1307_v33  ;;  %v980_v36 = vunpack.i.l.bf16 %v1307_v33  ;;  %v336_v42 = vsel %vm335_vm4, %v330_v34, %v975_v32 }
  0x9d   : > { %v348_v38 = vsel %vm346_vm5, %v980_v36, %v981_v35 }
  0x9e   : > { %v341_v39 = vpop.permute.xlu1 %340  ;;  %v1317_v40 = vpop.permute.xlu0 %983  ;;  %v389_v41 = vpack.c.bf16 %v348_v38, %v337_v37 }
  0x9f   : > { %v347_v43 = vsel %vm346_vm5, %v341_v39, %v980_v36  ;;  %v986_v45 = vunpack.i.h.bf16 %v1317_v40  ;;  %v985_v46 = vunpack.i.l.bf16 %v1317_v40 }
  0xa0   : > { %v388_v44 = vpack.c.bf16 %v347_v43, %v336_v42  ;;  %420 = vmatprep.subr.bf16.mxu1 %v389_v41 }
  0xa1   : > { %v315_v51 = vsel %vm313_vm6, %v985_v46, %v986_v45 }
  0xa2   : > { %v1323_v47 = vpop.permute.xlu1 %988  ;;  %v308_v48 = vpop.permute.xlu0 %307  ;;  %421 = vmatpush1.bf16.msra.mxu1 %v388_v44 }
  0xa3   : > { %v991_v49 = vunpack.i.h.bf16 %v1323_v47  ;;  %v990_v50 = vunpack.i.l.bf16 %v1323_v47  ;;  %v314_v56 = vsel %vm313_vm6, %v308_v48, %v985_v46  ;;  %v453_v47 = vld [vmem:[%s1583_s3] sm:$0xf] }
  0xa5   : > { %v326_v52 = vsel %vm324_vm7, %v990_v50, %v991_v49 }
  0xa6   : > { %v319_v53 = vpop.permute.xlu1 %318  ;;  %v994_v54 = vpop.permute.xlu0 %993  ;;  %v387_v55 = vpack.c.bf16 %v326_v52, %v315_v51 }
  0xa7   : > { %v325_v57 = vsel %vm324_vm7, %v319_v53, %v990_v50  ;;  %v1335_v58 = vunpack.i.h.bf16 %v994_v54  ;;  %v995_v59 = vunpack.i.l.bf16 %v994_v54 }
  0xa8   : > { %v386_v60 = vpack.c.bf16 %v325_v57, %v314_v56  ;;  %422 = vmatprep.subr.bf16.mxu1 %v387_v55 }
  0xa9   : > { %v304_v61 = vsel %vm302_vm8, %v995_v59, %v1335_v58 }
  0xaa   : > { %v297_v62 = vpop.permute.xlu1 %296  ;;  %423 = vmatpush1.bf16.msra.mxu1 %v386_v60  ;;  %v385_v63 = vpack.c.bf16 %v304_v61, %v1246_v1 }
  0xab   : > { %v303_v0 = vsel %vm302_vm8, %v297_v62, %v995_v59 }
  0xac   : > { %v384_v3 = vpack.c.bf16 %v303_v0, %v1248_v2  ;;  %424 = vmatprep.subr.bf16.mxu1 %v385_v63 }
  0xae   : > { %425 = vmatpush1.bf16.msra.mxu1 %v384_v3 }
  0xb1   : > { %856 = vmatmul.mubr.msk.bf16.vlgmr.msra.gmra.mxu1 %vm399_vm9, %v291_v4 }
  0xb2   : > { %577 = vmatprep.mubr.bf16.mxu1 %v1147_v5  ;;  %v454_v5 = vld [vmem:[%s1584_s4] sm:$0xff] }
  0xb3   : > { %v397_v6 = vpop.permute.xlu0 %396 }
 0x171   : > { %v444_v9 = vpop.f32.mrf.mxu1 }
 0x172   : > { %v445_v10 = vadd.f32 %v444_v9, %v397_v6 }
 0x173   : > { %v446_v11 = vpop.f32.mrf.mxu1 }
 0x174   : > { %v447_v1 = vadd.f32 %v446_v11, %v397_v6  ;;  %v1347_v14 = vmax.f32 %v445_v10, 0.0 }
 0x175   : > { %v448_v13 = vpop.f32.mrf.mxu1 }
 0x176   : > { %v1349_v2 = vmax.f32 %v447_v1, 0.0 }
 0x177   : > { %v449_v15 = vpop.f32.mrf.mxu1 }
 0x178   : > { %v1008_v17 = vpack.i.bf16 %v1347_v14, %v1349_v2  ;;  %v998_v18 = vpack.i.bf16 %v1349_v2, %v1347_v14  ;;  %v634_v15 = vld [vmem:[%s1585_s5 + $0x78] sm:$0xff] }
 0x17a   : > { %1009 = vrot.lane.b32.xlu0 %v1008_v17, %s1143_s20  ;;  %999 = vrot.lane.b32.xlu1 %v998_v18, %s1141_s13  ;;  %s1405_s20 = sand.u32 1, %s1130_s25  }
 0x17e   : > { %1019 = vrot.lane.b32.xlu0 %v1008_v17, %s1145_s22  ;;  %1004 = vrot.lane.b32.xlu1 %v1008_v17, %s1142_s19 }
 0x182   : > { %1029 = vrot.lane.b32.xlu0 %v1008_v17, %s1148_s29  ;;  %1014 = vrot.lane.b32.xlu1 %v1008_v17, %s1144_s21  ;;  %s851_s21 = sshll.u32 %s1405_s20, 4 }
 0x183   : > { %s1422_s13 = scalar_lea.vmem [#allocation2], %s851_s21 }
 0x186   : > { %533 = vperm.xlu0 %997, %v454_v5   ;;  %1024 = vrot.lane.b32.xlu1 %v1008_v17, %s1146_s23  ;;  %v633_v5 = vld [vmem:[%s1585_s5 + $0x70] sm:$0xff]  ;;  %s867_s23 = sshll.u32 %s1213_s28, 8 }
 0x187   : > { %s741_s14 = scalar_lea.hbm %s1586_s6, %s867_s23 }
 0x18a   : > { %1034 = vrot.lane.b32.xlu1 %v1008_v17, %s1149_s8  ;;  %v649_v17 = vld [vmem:[%s1585_s5 + $0xf0] sm:$0xff] }
 0x1ec   : > { %v1010_v19 = vpop.permute.xlu0 %1009  ;;  %v1000_v21 = vpop.permute.xlu1 %999 }
 0x1ed   : > { %v1002_v22 = vunpack.i.h.bf16 %v1000_v21  ;;  %v1001_v23 = vunpack.i.l.bf16 %v1000_v21  ;;  %v1012_v24 = vunpack.i.h.bf16 %v1010_v19  ;;  %v1011_v25 = vunpack.i.l.bf16 %v1010_v19  ;;  %v648_v21 = vld [vmem:[%s1585_s5 + $0xe8] sm:$0xff] }
 0x1ef   : > { %v518_v27 = vsel %vm379_vm0, %v1002_v22, %v1280_v7  ;;  %v517_v28 = vsel %vm379_vm0, %v1001_v23, %v1002_v22  ;;  %v509_v42 = vsel %vm368_vm3, %v1012_v24, %v1011_v25  ;;  %v510_v44 = vsel %vm368_vm3, %v1011_v25, %v971_v20  ;;  %v632_v23 = vld [vmem:[%s1585_s5 + $0x68] sm:$0xff]  ;;  %v647_v25 = vld [vmem:[%s1585_s5 + $0xe0] sm:$0xff] }
 0x1f0   : > { %v530_v29 = vpack.c.bf16 %v518_v27, %v518_v27  ;;  %v1020_v30 = vpop.permute.xlu0 %1019  ;;  %v1005_v32 = vpop.permute.xlu1 %1004  ;;  %v529_v34 = vpack.c.bf16 %v517_v28, %v517_v28  ;;  %v631_v27 = vld [vmem:[%s1585_s5 + $0x60] sm:$0xff]  ;;  %v646_v28 = vld [vmem:[%s1585_s5 + $0xd8] sm:$0xff] }
 0x1f1   : > { %v1007_v36 = vunpack.i.h.bf16 %v1005_v32  ;;  %v1006_v37 = vunpack.i.l.bf16 %v1005_v32  ;;  %v1022_v38 = vunpack.i.h.bf16 %v1020_v30  ;;  %v1021_v39 = vunpack.i.l.bf16 %v1020_v30  ;;  %v645_v30 = vld [vmem:[%s1585_s5 + $0xd0] sm:$0xff] }
 0x1f2   : > { %857 = vmatprep.subr.msk.bf16.mxu1 %vm403_vm1, %v530_v29  ;;  %v540_v41 = vsel %vm403_vm1, %v529_v34, 0  ;;  %v630_v29 = vld [vmem:[%s1585_s5 + $0x58] sm:$0xff]  ;;  %v629_v32 = vld [vmem:[%s1585_s5 + $0x50] sm:$0xff]  ;;  %v644_v34 = vld [vmem:[%s1585_s5 + $0xc8] sm:$0xff] }
 0x1f3   : > { %v501_v43 = vsel %vm357_vm2, %v1007_v36, %v1006_v37  ;;  %552 = vmatpush1.bf16.msra.mxu1 %v540_v41  ;;  %v502_v7 = vsel %vm357_vm2, %v1006_v37, %v966_v12  ;;  %v493_v54 = vsel %vm346_vm5, %v1022_v38, %v1021_v39  ;;  %v494_v55 = vsel %vm346_vm5, %v1021_v39, %v981_v35  ;;  %v628_v36 = vld [vmem:[%s1585_s5 + $0x48] sm:$0xff]  ;;  %v643_v37 = vld [vmem:[%s1585_s5 + $0xc0] sm:$0xff]  ;;  %v642_v39 = vld [vmem:[%s1585_s5 + $0xb8] sm:$0xff] }
 0x1f4   : > { %v527_v46 = vpack.c.bf16 %v509_v42, %v501_v43  ;;  %v1030_v48 = vpop.permute.xlu0 %1029  ;;  %v1015_v50 = vpop.permute.xlu1 %1014  ;;  %v528_v51 = vpack.c.bf16 %v510_v44, %v502_v7  ;;  %v627_v38 = vld [vmem:[%s1585_s5 + $0x40] sm:$0xff]  ;;  %v626_v41 = vld [vmem:[%s1585_s5 + $0x38] sm:$0xff]  ;;  %v641_v42 = vld [vmem:[%s1585_s5 + $0xb0] sm:$0xff] }
 0x1f5   : > { %v1017_v52 = vunpack.i.h.bf16 %v1015_v50  ;;  %v1016_v53 = vunpack.i.l.bf16 %v1015_v50  ;;  %v1032_v8 = vunpack.i.h.bf16 %v1030_v48  ;;  %v1031_v56 = vunpack.i.l.bf16 %v1030_v48  ;;  %v625_v43 = vld [vmem:[%s1585_s5 + $0x30] sm:$0xff]  ;;  %v640_v7 = vld [vmem:[%s1585_s5 + $0xa8] sm:$0xff]  ;;  %v623_v48 = vld [vmem:[%s1585_s5 + $0x20] sm:$0xff] }
 0x1f6   : > { %553 = vmatprep.subr.bf16.mxu1 %v528_v51  ;;  %v624_v44 = vld [vmem:[%s1585_s5 + $0x28] sm:$0xff]  ;;  %v638_v50 = vld [vmem:[%s1585_s5 + $0x98] sm:$0xff] }
 0x1f7   : > { %v485_v12 = vsel %vm335_vm4, %v1017_v52, %v1016_v53  ;;  %554 = vmatpush1.bf16.msra.mxu1 %v527_v46  ;;  %v486_v16 = vsel %vm335_vm4, %v1016_v53, %v976_v31  ;;  %v477_v62 = vsel %vm324_vm7, %v1032_v8, %v1031_v56  ;;  %v478_v26 = vsel %vm324_vm7, %v1031_v56, %v991_v49  ;;  %v639_v46 = vld [vmem:[%s1585_s5 + $0xa0] sm:$0xff]  ;;  %v622_v51 = vld [vmem:[%s1585_s5 + $0x18] sm:$0xff]  ;;  %v637_v52 = vld [vmem:[%s1585_s5 + $0x90] sm:$0xff] }
 0x1f8   : > { %v525_v20 = vpack.c.bf16 %v493_v54, %v485_v12  ;;  %v1025_v57 = vpop.permute.xlu1 %1024  ;;  %v526_v59 = vpack.c.bf16 %v494_v55, %v486_v16  ;;  %v621_v53 = vld [vmem:[%s1585_s5 + $0x10] sm:$0xff]  ;;  %v636_v54 = vld [vmem:[%s1585_s5 + $0x88] sm:$0xff]  ;;  %v635_v8 = vld [vmem:[%s1585_s5 + $0x80] sm:$0xff] }
 0x1f9   : > { %v1027_v60 = vunpack.i.h.bf16 %v1025_v57  ;;  %v1026_v61 = vunpack.i.l.bf16 %v1025_v57  ;;  %v620_v55 = vld [vmem:[%s1585_s5 + $0x8] sm:$0xff]  ;;  %v619_v56 = vld [vmem:[%s1585_s5] sm:$0xff] }
 0x1fa   : > { %555 = vmatprep.subr.bf16.mxu1 %v526_v59 }
 0x1fb   : > { %v469_v33 = vsel %vm313_vm6, %v1027_v60, %v1026_v61  ;;  %556 = vmatpush1.bf16.msra.mxu1 %v525_v20  ;;  %v470_v35 = vsel %vm313_vm6, %v1026_v61, %v986_v45 }
 0x1fc   : > { %v523_v31 = vpack.c.bf16 %v477_v62, %v469_v33  ;;  %v1035_v63 = vpop.permute.xlu1 %1034  ;;  %v524_v0 = vpack.c.bf16 %v478_v26, %v470_v35  ;;  %v603_v62 = vmax.f32 %v1335_v58, 0.0 }
 0x1fd   : > { %v1037_v3 = vunpack.i.h.bf16 %v1035_v63  ;;  %v1036_v4 = vunpack.i.l.bf16 %v1035_v63 }
 0x1fe   : > { %557 = vmatprep.subr.bf16.mxu1 %v524_v0 }
 0x1ff   : > { %v461_v6 = vsel %vm302_vm8, %v1037_v3, %v1036_v4  ;;  %558 = vmatpush1.bf16.msra.mxu1 %v523_v31  ;;  %v462_v9 = vsel %vm302_vm8, %v1036_v4, %v1335_v58 }
 0x200   : > { %v521_v40 = vpack.c.bf16 %v461_v6, %v1347_v14  ;;  %v522_v45 = vpack.c.bf16 %v462_v9, %v1349_v2  ;;  %v650_v2 = vld [vmem:[%s1585_s5 + $0xf8] sm:$0xff] }
 0x201   : > { %v534_v49 = vpop.permute.xlu0 %533  ;;  %868 = vmatprep.subr.mxu0 %v650_v2 }
 0x202   : > { %559 = vmatprep.subr.bf16.mxu1 %v522_v45  ;;  %869 = vmatpush3.msra.mxu0 %v634_v15 }
 0x203   : > { %560 = vmatpush1.bf16.msra.mxu1 %v521_v40  ;;  %870 = vmatprep.subr.mxu0 %v649_v17 }
 0x204   : > { %871 = vmatpush3.msra.mxu0 %v633_v5 }
 0x205   : > { %872 = vmatprep.subr.mxu0 %v648_v21 }
 0x206   : > { %858 = vmatmul.mubr.msk.bf16.vlgmr.msra.gmra.mxu1 %vm399_vm9, %v453_v47  ;;  %873 = vmatpush3.msra.mxu0 %v632_v23 }
 0x207   : > { %874 = vmatprep.subr.mxu0 %v647_v25 }
 0x208   : > { %875 = vmatpush3.msra.mxu0 %v631_v27 }
 0x209   : > { %876 = vmatprep.subr.mxu0 %v646_v28 }
 0x20a   : > { %877 = vmatpush3.msra.mxu0 %v630_v29 }
 0x20b   : > { %878 = vmatprep.subr.mxu0 %v645_v30 }
 0x20c   : > { %879 = vmatpush3.msra.mxu0 %v629_v32 }
 0x20d   : > { %880 = vmatprep.subr.mxu0 %v644_v34 }
 0x20e   : > { %881 = vmatpush3.msra.mxu0 %v628_v36 }
 0x20f   : > { %882 = vmatprep.subr.mxu0 %v643_v37 }
 0x210   : > { %883 = vmatpush3.msra.mxu0 %v627_v38 }
 0x211   : > { %884 = vmatprep.subr.mxu0 %v642_v39 }
 0x212   : > { %885 = vmatpush3.msra.mxu0 %v626_v41 }
 0x213   : > { %886 = vmatprep.subr.mxu0 %v641_v42 }
 0x214   : > { %887 = vmatpush3.msra.mxu0 %v625_v43 }
 0x215   : > { %888 = vmatprep.subr.mxu0 %v640_v7 }
 0x216   : > { %889 = vmatpush3.msra.mxu0 %v624_v44 }
 0x217   : > { %890 = vmatprep.subr.mxu0 %v639_v46 }
 0x218   : > { %891 = vmatpush3.msra.mxu0 %v623_v48 }
 0x219   : > { %892 = vmatprep.subr.mxu0 %v638_v50 }
 0x21a   : > { %893 = vmatpush3.msra.mxu0 %v622_v51 }
 0x21b   : > { %894 = vmatprep.subr.mxu0 %v637_v52 }
 0x21c   : > { %895 = vmatpush3.msra.mxu0 %v621_v53 }
 0x21d   : > { %896 = vmatprep.subr.mxu0 %v636_v54 }
 0x21e   : > { %897 = vmatpush3.msra.mxu0 %v620_v55 }
 0x21f   : > { %898 = vmatprep.subr.mxu0 %v635_v8 }
 0x220   : > { %899 = vmatpush3.msra.mxu0 %v619_v56 }
 0x2c6   : > { %v579_v10 = vpop.f32.mrf.mxu1 }
 0x2c7   : > { %v580_v11 = vadd.f32 %v579_v10, %v534_v49 }
 0x2c8   : > { %v581_v1 = vpop.f32.mrf.mxu1 }
 0x2c9   : > { %v1408_v13 = vmax.f32 %v580_v11, 0.0  ;;  %v582_v14 = vadd.f32 %v581_v1, %v534_v49 }
 0x2ca   : > { %v583_v18 = vpop.f32.mrf.mxu1 }
 0x2cb   : > { %588 = vst [vmem:[%s1422_s13] sm:$0xff] %v1408_v13  ;;  %v1426_v19 = vmax.f32 %v582_v14, 0.0 }
 0x2cc   : > { %v584_v22 = vpop.f32.mrf.mxu1 }
 0x2cd   : > { %589 = vst [vmem:[%s1422_s13 + $0x8] sm:$0xff] %v1426_v19  ;;  %v1038_v24 = vpack.i.bf16 %v1408_v13, %v1426_v19 }
 0x2cf   : > { %1039 = vrot.lane.b32.xlu1 %v1038_v24, %s1149_s8  ;;  %s743_s8 = sshll.u32 %s1422_s13, 4  ;;  %s744_s8 = int_to_ptr.vmem [resolvable:$true] %s743_s8 }
 0x2d0   : > { %s1048_s15 = scalar_lea.vmem %s744_s8, 256  ;;  %p1055_p0 = scmp.lt.s32.totalorder %s744_s8, %s1053_s17 }
 0x2d1   : > { %p1049_p11 = scmp.ne.s32.totalorder %s744_s8, %s1048_s15  ;;  %p1056_p1 = scmp.lt.s32.totalorder %s1054_s18, %s1048_s15 }
 0x2d3   : > { %p1050_p12 = pnand %p1049_p11, %p1230_p5  ;;  %p1057_p2 = por %p1056_p1, %p1055_p0 }
 0x2d5   : > { %p1051_p13 = pneg %p1050_p12 }
 0x2d7   : > { %p1058_p3 = pnand %p1057_p2, %p1051_p13 }
 0x341   : > { %v1040_v12 = vpop.permute.xlu1 %1039 }
 0x342   : > { %v1042_v16 = vunpack.i.h.bf16 %v1040_v12  ;;  %v1041_v20 = vunpack.i.l.bf16 %v1040_v12 }
 0x344   : > { %v597_v57 = vsel %vm302_vm8, %v1041_v20, %v1335_v58  ;;  %v596_v59 = vsel %vm302_vm8, %v1042_v16, %v1041_v20 }
 0x345   : > { %v600_v60 = vmax.f32 %v1408_v13, %v596_v59  ;;  %v601_v61 = vmax.f32 %v1426_v19, %v597_v57 }
 0x347   : > { %607 = vrot.lane.b32.xlu1 %v600_v60, %s1148_s29  ;;  %v1043_v33 = vpack.i.bf16 %v603_v62, %v601_v61 }
 0x349   : > { %1044 = vrot.lane.b32.xlu0 %v1043_v33, %s1148_s29  ;;  %s724_s29 = scalar_lea.sflag [#allocation3], %s1405_s20 }
 0x3b9   : > { %v608_v63 = vpop.permute.xlu1 %607 }
 0x3bb   : > { %v1045_v35 = vpop.permute.xlu0 %1044 }
 0x3bc   : > { %v1047_v26 = vunpack.i.h.bf16 %v1045_v35  ;;  %v1046_v31 = vunpack.i.l.bf16 %v1045_v35 }
 0x3be   : > { %v614_v0 = vsel %vm324_vm7, %v1046_v31, %v1047_v26  ;;  %v613_v3 = vsel %vm324_vm7, %v608_v63, %v1046_v31 }
 0x3bf   : > { %v618_v4 = vmax.f32 %v601_v61, %v614_v0  ;;  %v617_v6 = vmax.f32 %v600_v60, %v613_v3 }
 0x3c1   : > { %715 = vmatprep.mubr.f32.mxu0 %v618_v4 }
 0x3c2   : > { %716 = vmatmul.mubr.f32.vlgmr.msra.gmra.mxu0 %v617_v6 }
 0x3c3   : > { %1061 = shalt.err (!%p1058_p3)
}
 0x3c4   : > { %s1062_s19 = scalar_lea.hbm %s741_s14, 256  ;;  %s1066_s23 = scalar_lea.hbm %s1586_s6, 512 }
 0x3c5   : > { %p1063_p4 = scmp.ne.s32.totalorder %s741_s14, %s1062_s19  ;;  %p1067_p9 = scmp.lt.s32.totalorder %s741_s14, %s1586_s6 }
 0x3c6   : > { %p1068_p10 = scmp.lt.s32.totalorder %s1066_s23, %s1062_s19 }
 0x3c7   : > { %p1064_p7 = pnand %p1063_p4, %p1230_p5 }
 0x3c8   : > { %p1069_p11 = por %p1068_p10, %p1067_p9 }
 0x3c9   : > { %p1065_p8 = pneg %p1064_p7 }
 0x3cb   : > { %p1070_p12 = pnand %p1069_p11, %p1065_p8 }
 0x3cd   : > { %1073 = shalt.err (!%p1070_p12)
}
 0x3ce   : > { %903 = dma.vmem_to_hbm [thread:$0]  (%p1230_p5), %s744_s8, 256, %s741_s14, %s724_s29   ;;  %vm721_vm10 = vcmask 293888  }
 0x3cf   : > { %s852_s15 = sshll.u32 %s1405_s20, 3  ;;  %s863_s16 = sshll.u32 %s1213_s28, 7 }
 0x3d0   : > { %s282_s17 = scalar_lea.vmem [#allocation4], %s852_s15  ;;  %s754_s22 = scalar_lea.hbm %s1587_s7, %s863_s16 }
 0x3d1   : > { %s756_s18 = sshll.u32 %s282_s17, 4  ;;  %s729_s23 = scalar_lea.sflag [#allocation5], %s1405_s20  ;;  %s757_s18 = int_to_ptr.vmem [resolvable:$true] %s756_s18 }
 0x3d2   : > { %s1074_s9 = scalar_lea.vmem %s757_s18, 128  ;;  %s1151_s14 = smov [#allocation4]  }
 0x3d3   : > { %p1075_p13 = scmp.ne.s32.totalorder %s757_s18, %s1074_s9  ;;  %s1078_s8 = sshll.u32 %s1151_s14, 4  ;;  %s1079_s8 = int_to_ptr.vmem [resolvable:$false] %s1078_s8 }
 0x3d4   : > { %s1080_s28 = scalar_lea.vmem %s1079_s8, 256  ;;  %p1081_p2 = scmp.lt.s32.totalorder %s757_s18, %s1079_s8 }
 0x3d5   : > { %p1076_p0 = pnand %p1075_p13, %p1230_p5  ;;  %p1082_p3 = scmp.lt.s32.totalorder %s1080_s28, %s1074_s9 }
 0x3d7   : > { %p1077_p1 = pneg %p1076_p0  ;;  %p1083_p4 = por %p1082_p3, %p1081_p2 }
 0x3d9   : > { %p1084_p7 = pnand %p1083_p4, %p1077_p1 }
 0x482   : > { %v900_v58 = vpop.f32.mrf.mxu0 }
 0x484   : > { %v901_v9 = vpop.f32.mrf.mxu0 }
 0x485   : > { %v902_v40 = vadd.f32 %v901_v9, %v900_v58 }
 0x487   : > { %722 = vst.msk [vmem:[%s282_s17] sm:$0xff] %vm721_vm10, %v902_v40 }
 0x488   : > { %1087 = shalt.err (!%p1084_p7)
}
 0x489   : > { %s1088_s29 = scalar_lea.hbm %s754_s22, 128  ;;  %s1092_s15 = scalar_lea.hbm %s1587_s7, 256 }
 0x48a   : > { %p1089_p8 = scmp.ne.s32.totalorder %s754_s22, %s1088_s29  ;;  %p1093_p11 = scmp.lt.s32.totalorder %s754_s22, %s1587_s7 }
 0x48b   : > { %p1094_p12 = scmp.lt.s32.totalorder %s1092_s15, %s1088_s29 }
 0x48c   : > { %p1090_p9 = pnand %p1089_p8, %p1230_p5 }
 0x48d   : > { %p1095_p13 = por %p1094_p12, %p1093_p11 }
 0x48e   : > { %p1091_p10 = pneg %p1090_p9 }
 0x490   : > { %p1096_p0 = pnand %p1095_p13, %p1091_p10 }
 0x492   : > { %1099 = shalt.err (!%p1096_p0)
}
 0x493   : > { %904 = dma.vmem_to_hbm [thread:$0]  (%p1230_p5), %s757_s18, 128, %s754_s22, %s729_s23  }
 0x494 PF: > { %p914_p1 = scmp.ge.s32.totalorder %s1138_s27, 2  ;;  %s768_s13 = sand.u32 1, %s1126_s24  }
 0x495   : > { %s769_s19 = scalar_lea.sflag [#allocation3], %s768_s13 }
 0x496   : > { %p908_p2 = pnand %p914_p1, %p1234_p6 }
 0x498   : > { %p909_p3 = pneg %p908_p2 }
 0x49a   : > { %1117 = dma.done.wait (%p909_p3), %s769_s19, 256  }
 0x49b   : > { %1119 = vsyncadd (%p909_p3), %s769_s19, 4294967040  ;;  %s778_s9 = scalar_lea.sflag [#allocation5], %s768_s13 }
 0x49c   : > { %1121 = dma.done.wait (%p909_p3), %s778_s9, 128  }
 0x49d   : > { %1123 = vsyncadd (%p909_p3), %s778_s9, 4294967168  ;;  %p21_p5 = scmp.ge.s32.totalorder %s1217_s30, 4   ;;  %s1590_s24 = smov %s1130_s25 }
 0x49e   : > { %s1591_s25 = smov %s1134_s26  ;;  %s1592_s26 = smov %s1228_s10 }
 0x49f   : > { %s1593_s27 = smov %s1217_s30  ;;  %23 = sbr.rel (!%p21_p5) target bundleno = 5 (0x5), region = 96 }
 0x4a4   :  { %783 = vsyncpa [#allocation3], 1 }
 0x4a5   :  { %785 = vsyncpa [#allocation3 + $0x1], 1 }
 0x4a6   :  { %786 = vsyncpa [#allocation5], 1 }
 0x4a7   :  { %788 = vsyncpa [#allocation5 + $0x1], 1 }

</bundles_post_ra>
